<compile_context>
chip_gen: v6e
topology: v6e:2x2x1
jax: 0.10.0
libtpu: 0.0.40
codegen_flags: <defaults>
</compile_context>

<pallas_src>
import jax
import jax.numpy as jnp
from jax.experimental import pallas as pl
from jax.experimental.pallas import tpu as pltpu

_LANES = 128       # vreg lane width
_SUBLANES = 8      # vreg sublane count (f32)
_ROW_TILE = 1024   # rows per grid step -> 1024x128 f32 = 512 KiB per tile


def _my_linear_kernel(a_ref, b_ref, x_ref, o_ref):
    # yhat = a * x + b; a/b are SMEM scalars read once, broadcast over the tile.
    a = a_ref[0]
    b = b_ref[0]
    o_ref[...] = a * x_ref[...] + b


def my_linear(a, b, x, *, row_tile=_ROW_TILE):
    """Pallas implementation of MyLinear.forward: yhat = a * x + b."""
    orig_shape = x.shape
    dtype = x.dtype
    n = x.size

    # Lay the flat vector out as (rows, 128): last dim on the lane axis.
    rows = pl.cdiv(n, _LANES)
    if rows <= row_tile:
        # Single grid step: round rows up to a sublane multiple.
        block_rows = max(_SUBLANES, ((rows + _SUBLANES - 1) // _SUBLANES) * _SUBLANES)
    else:
        block_rows = row_tile
    padded_rows = ((rows + block_rows - 1) // block_rows) * block_rows
    padded_n = padded_rows * _LANES

    x_flat = x.reshape(-1)
    if padded_n != n:
        x_flat = jnp.pad(x_flat, (0, padded_n - n))
    x2 = x_flat.reshape(padded_rows, _LANES)

    grid = (padded_rows // block_rows,)

    out = pl.pallas_call(
        _my_linear_kernel,
        out_shape=jax.ShapeDtypeStruct((padded_rows, _LANES), dtype),
        grid=grid,
        in_specs=[
            pl.BlockSpec(memory_space=pltpu.MemorySpace.SMEM),   # a (1,)
            pl.BlockSpec(memory_space=pltpu.MemorySpace.SMEM),   # b (1,)
            pl.BlockSpec((block_rows, _LANES), lambda i: (i, 0)),  # x tile
        ],
        out_specs=pl.BlockSpec((block_rows, _LANES), lambda i: (i, 0)),
        compiler_params=pltpu.CompilerParams(
            dimension_semantics=("parallel",),      # shards across TCs on v7x
            vmem_limit_bytes=32 * 1024 * 1024,      # safe on v5e/v6e/v7x
        ),
    )(a, b, x2)

    return out.reshape(-1)[:n].reshape(orig_shape)


if __name__ == "__main__":
    key = jax.random.PRNGKey(0)
    ka, kb, kx = jax.random.split(key, 3)

    # Deterministic parameter init mirroring torch.nn.Parameter(torch.rand(1))
    a = jax.random.uniform(ka, (1,), dtype=jnp.float32)
    b = jax.random.uniform(kb, (1,), dtype=jnp.float32)

    # Input matching the script: x = arange(100, dtype=float32) / 100
    x = jnp.arange(100, dtype=jnp.float32) / 100.0

    yhat = my_linear(a, b, x)
    jax.block_until_ready(yhat)

    ref = a[0] * x + b[0]
    assert yhat.shape == x.shape
    assert yhat.dtype == jnp.float32
    assert jnp.allclose(yhat, ref, atol=1e-6, rtol=1e-6)

    # Secondary check: a larger, non-aligned N that exercises the row grid,
    # tile pipelining, and tail padding/slicing (grid = (3,)).
    x_big = jax.random.normal(kx, (300_000,), dtype=jnp.float32)
    yhat_big = my_linear(a, b, x_big)
    jax.block_until_ready(yhat_big)
    ref_big = a[0] * x_big + b[0]
    assert yhat_big.shape == x_big.shape
    assert jnp.allclose(yhat_big, ref_big, atol=1e-6, rtol=1e-6)

    print("KERNEL_OK")
</pallas_src>

<mosaic_0001>
module attributes {stable_mosaic.version = 11 : i64} {
  func.func @_my_linear_kernel(%arg0: i32, %arg1: memref<1xf32, #tpu.memory_space<smem>>, %arg2: memref<1xf32, #tpu.memory_space<smem>>, %arg3: memref<8x128xf32, #tpu.memory_space<vmem>>, %arg4: memref<8x128xf32, #tpu.memory_space<vmem>>) attributes {dimension_semantics = [#tpu.dimension_semantics<parallel>], iteration_bounds = array<i64: 1>, scalar_prefetch = 0 : i64, scratch_operands = 0 : i64, tpu.core_type = #tpu.core_type<tc>, window_params = [{transform_indices = @transform_0, window_bounds = array<i64: 1>}, {transform_indices = @transform_1, window_bounds = array<i64: 1>}, {transform_indices = @transform_2, window_bounds = array<i64: 8, 128>}, {transform_indices = @transform_3, window_bounds = array<i64: 8, 128>}]} {
    %c0 = arith.constant 0 : index
    %0 = memref.load %arg1[%c0] : memref<1xf32, #tpu.memory_space<smem>>
    %c0_0 = arith.constant 0 : index
    %1 = memref.load %arg2[%c0_0] : memref<1xf32, #tpu.memory_space<smem>>
    %c0_1 = arith.constant 0 : index
    %c0_2 = arith.constant 0 : index
    %2 = vector.load %arg3[%c0_1, %c0_2] : memref<8x128xf32, #tpu.memory_space<vmem>>, vector<8x128xf32>
    %3 = vector.broadcast %0 : f32 to vector<8x128xf32>
    %4 = arith.mulf %3, %2 : vector<8x128xf32>
    %5 = vector.broadcast %1 : f32 to vector<8x128xf32>
    %6 = arith.addf %4, %5 : vector<8x128xf32>
    %c0_3 = arith.constant 0 : index
    %c0_4 = arith.constant 0 : index
    %7 = vector.load %arg4[%c0_3, %c0_4] : memref<8x128xf32, #tpu.memory_space<vmem>>, vector<8x128xf32>
    tpu.vector_store %arg4[%c0_3, %c0_4], %6 {strides = array<i32>} : memref<8x128xf32, #tpu.memory_space<vmem>>, vector<8x128xf32>,
    return
  }
  func.func @transform_0(%arg0: i32) -> i32 {
    %c0_i32 = arith.constant 0 : i32
    %c0_i32_0 = arith.constant 0 : i32
    return %c0_i32 : i32
  }
  func.func @transform_1(%arg0: i32) -> i32 {
    %c0_i32 = arith.constant 0 : i32
    %c0_i32_0 = arith.constant 0 : i32
    return %c0_i32 : i32
  }
  func.func @transform_2(%arg0: i32) -> (i32, i32) {
    %c0_i32 = arith.constant 0 : i32
    %c0_i32_0 = arith.constant 0 : i32
    return %arg0, %c0_i32 : i32, i32
  }
  func.func @transform_3(%arg0: i32) -> (i32, i32) {
    %c0_i32 = arith.constant 0 : i32
    %c0_i32_0 = arith.constant 0 : i32
    return %arg0, %c0_i32 : i32, i32
  }
}

</mosaic_0001>

<bundles_post_ra>
// kernel: tpu_custom_call.1
= control target key start
LH: loop header
LB: loop body
LE: loop exit
PB: predicated region body
PF: predicated region fallthrough
CT: control target
= control target key end

     0   :  { %10 = vsyncpa [#allocation5], 0  ;;  %s132_s0 = inlined_call_operand.<no memory space> [shape: f32[1], index: 0, kind: input, shape index: {}]   ;;  %s133_s1 = inlined_call_operand.<no memory space> [shape: f32[1], index: 1, kind: input, shape index: {}]   ;;  %s134_s2 = inlined_call_operand.hbm [shape: f32[8,128], index: 2, kind: input, shape index: {}]   ;;  %s135_s3 = inlined_call_operand.hbm [shape: f32[8,128], index: 3, kind: output, shape index: {}]  }
   0x1   :  { %11 = vsyncpa [#allocation6], 0  ;;  %s98_s12 = smov [#allocation4]  }
   0x2   :  { %s22_s13 = sshll.u32 %s98_s12, 4  ;;  %s23_s13 = int_to_ptr.vmem [resolvable:$true] %s22_s13 }
   0x3   :  { %s62_s14 = scalar_lea.vmem %s23_s13, 128  ;;  %p67_p1 = scmp.lt.s32.totalorder %s23_s13, %s23_s13 }
   0x4   :  { %p63_p0 = scmp.ne.s32.totalorder %s23_s13, %s62_s14  ;;  %p68_p2 = scmp.lt.s32.totalorder %s62_s14, %s62_s14 }
   0x6   :  { %p69_p3 = por %p68_p2, %p67_p1 }
   0x8   :  { %p70_p4 = pnand %p69_p3, %p63_p0 }
   0xa   :  { %73 = shalt.err (!%p70_p4)
}
   0xb   :  { %25 = dma.hbm_to_vmem [thread:$0]  %s134_s2, 128, %s23_s13, [#allocation5]  }
   0xc   :  { %94 = dma.done.wait [#allocation5], 128  }
   0xd   :  { %95 = vsyncadd [#allocation5], 4294967168  ;;  %v32_v0 = vstv %s132_s0  ;;  %v31_v1 = vld [vmem:[#allocation4] sm:$0xff]  ;;  %v34_v2 = vstv %s133_s1  ;;  %s99_s21 = smov [#allocation7]  }
   0xe   :  { %s43_s22 = sshll.u32 %s99_s21, 4  ;;  %v33_v3 = vmul.f32 %v32_v0, %v31_v1  ;;  %s44_s22 = int_to_ptr.vmem [resolvable:$true] %s43_s22 }
   0xf   :  { %s74_s23 = scalar_lea.vmem %s44_s22, 128  ;;  %p79_p6 = scmp.lt.s32.totalorder %s44_s22, %s44_s22 }
  0x10   :  { %v35_v4 = vadd.f32 %v34_v2, %v33_v3  ;;  %p75_p5 = scmp.ne.s32.totalorder %s44_s22, %s74_s23  ;;  %p80_p7 = scmp.lt.s32.totalorder %s74_s23, %s74_s23 }
  0x12   :  { %36 = vst [vmem:[#allocation7] sm:$0xff] %v35_v4  ;;  %p81_p8 = por %p80_p7, %p79_p6 }
  0x14   :  { %p82_p9 = pnand %p81_p8, %p75_p5 }
  0x16   :  { %85 = shalt.err (!%p82_p9)
}
  0x17   :  { %46 = dma.vmem_to_hbm [thread:$0]  %s44_s22, 128, %s135_s3, [#allocation6]  }
  0x18   :  { %96 = dma.done.wait [#allocation6], 128  }
  0x19   :  { %97 = vsyncadd [#allocation6], 4294967168 }
  0x1a   :  { %50 = vsyncpa [#allocation5], 1 }
  0x1b   :  { %51 = vsyncpa [#allocation6], 1 }

</bundles_post_ra>
